<compile_context>
chip_gen: v5e
topology: v5e:2x2
jax: 0.10.0
libtpu: 0.0.40
codegen_flags: <defaults>
</compile_context>

<pallas_src>
import functools

import jax
import jax.numpy as jnp
from jax.experimental import pallas as pl
from jax.experimental.pallas import tpu as pltpu


def _round_up(x, m):
    return (x + m - 1) // m * m


def _fused_mlp_kernel(*refs, num_layers, mxu_dtype):
    """refs = (x_ref, w1, b1, w2, b2, ..., wN, bN, o_ref).

    Chains all Linear(+ReLU) layers on VMEM-resident data; single store at end.
    Weights arrive already cast to `mxu_dtype`; only activations are cast here.
    """
    x_ref = refs[0]
    o_ref = refs[-1]
    wb = refs[1:-1]

    h = x_ref[...]
    for i in range(num_layers):
        w = wb[2 * i][...]          # pre-cast (e.g. bf16) weights, no in-kernel cast
        b = wb[2 * i + 1][...]      # f32 bias row, broadcasts over the batch tile
        if mxu_dtype is not None:
            h = h.astype(mxu_dtype)
        # MXU matmul with f32 accumulation; bias add + ReLU in f32 on the VPU.
        h = jnp.dot(h, w, preferred_element_type=jnp.float32) + b
        if i < num_layers - 1:
            h = jnp.maximum(h, 0.0)
    o_ref[...] = h.astype(o_ref.dtype)


def fused_mlp(x, params, *, mxu_dtype=jnp.bfloat16, tm_max=512):
    """Fused y = MLP(x).

    x: (M, K0); params: list of (w: (K_i, K_{i+1}), b: (K_{i+1},)).
    Returns (M, K_last) in x.dtype.
    """
    M, K0 = x.shape
    num_layers = len(params)
    N_out = params[-1][0].shape[1]
    w_dtype = mxu_dtype if mxu_dtype is not None else x.dtype

    # ---- pad every feature dim to a multiple of 128 (lane-dense layouts) ----
    dims = [K0] + [w.shape[1] for w, _ in params]
    dims_p = [_round_up(d, 128) for d in dims]

    x_p = x if dims_p[0] == K0 else jnp.pad(x, ((0, 0), (0, dims_p[0] - K0)))

    padded_params = []
    for li, (w, b) in enumerate(params):
        kin, kout = w.shape
        kin_p, kout_p = dims_p[li], dims_p[li + 1]
        # Zero-pad (no-op math) then pre-cast weights for the MXU; biases stay f32.
        w_p = jnp.pad(w, ((0, kin_p - kin), (0, kout_p - kout))).astype(w_dtype)
        b_p = jnp.pad(b, (0, kout_p - kout)).astype(jnp.float32).reshape(1, kout_p)
        padded_params.append((w_p, b_p))
    N_p = dims_p[-1]

    # ---- pick the batch row tile and pad rows so the grid divides evenly ----
    if M >= 2 * tm_max:
        tm = tm_max                              # big batch: large tiles, many steps
    elif M >= 16:
        tm = _round_up(pl.cdiv(M, 2), 8)         # >= 2 grid steps (v7x megacore)
    else:
        tm = _round_up(max(M, 1), 8)             # tiny batch: one (8,128)-legal tile
    M_p = _round_up(M, tm)
    if M_p != M:
        x_p = jnp.pad(x_p, ((0, M_p - M), (0, 0)))
    grid = (M_p // tm,)

    # ---- specs / cost ----
    in_specs = [pl.BlockSpec((tm, dims_p[0]), lambda i: (i, 0))]  # batch tile of x
    flat_args = [x_p]
    flops = 0
    bytes_accessed = x_p.size * x_p.dtype.itemsize
    for w_p, b_p in padded_params:
        kin_p, kout_p = w_p.shape
        # Full-array, constant-index weight/bias blocks: DMA'd once, VMEM resident.
        in_specs.append(pl.BlockSpec((kin_p, kout_p), lambda i: (0, 0)))
        in_specs.append(pl.BlockSpec((1, kout_p), lambda i: (0, 0)))
        flat_args.append(w_p)
        flat_args.append(b_p)
        flops += 2 * M_p * kin_p * kout_p
        bytes_accessed += w_p.size * w_p.dtype.itemsize + b_p.size * b_p.dtype.itemsize
    bytes_accessed += M_p * N_p * x.dtype.itemsize

    kernel = functools.partial(
        _fused_mlp_kernel, num_layers=num_layers, mxu_dtype=mxu_dtype
    )

    out_p = pl.pallas_call(
        kernel,
        out_shape=jax.ShapeDtypeStruct((M_p, N_p), x.dtype),
        grid_spec=pl.GridSpec(
            grid=grid,
            in_specs=in_specs,
            out_specs=pl.BlockSpec((tm, N_p), lambda i: (i, 0)),
        ),
        compiler_params=pltpu.CompilerParams(
            dimension_semantics=("parallel",),
        ),
        cost_estimate=pl.CostEstimate(
            flops=flops, transcendentals=0, bytes_accessed=bytes_accessed
        ),
    )(*flat_args)

    return out_p[:M, :N_out]


class CustomNetPallas:
    """Mirror of the PyTorch CustomNet: Linear/ReLU stack, last layer linear."""

    def __init__(self, layers, key, dtype=jnp.float32):
        self.layers = layers
        self.params = []
        for i in range(len(layers) - 1):
            fan_in, fan_out = layers[i], layers[i + 1]
            key, kw, kb = jax.random.split(key, 3)
            bound = 1.0 / jnp.sqrt(jnp.asarray(fan_in, dtype))
            # PyTorch nn.Linear weight is (out, in); store transposed (in, out).
            w = jax.random.uniform(
                kw, (fan_in, fan_out), dtype, minval=-bound, maxval=bound
            )
            b = jax.random.uniform(kb, (fan_out,), dtype, minval=-bound, maxval=bound)
            self.params.append((w, b))

    def __call__(self, x, *, mxu_dtype=jnp.bfloat16):
        # Single fused pallas_call for the whole MLP (bf16 MXU path by default).
        return fused_mlp(x, self.params, mxu_dtype=mxu_dtype)

    def reference(self, x):
        n = len(self.params)
        for i, (w, b) in enumerate(self.params):
            x = x @ w + b
            if i < n - 1:
                x = jnp.maximum(x, 0.0)
        return x


if __name__ == "__main__":
    key = jax.random.PRNGKey(0)
    key, kx = jax.random.split(key)

    # DeepONet-style MLP; a batch of evaluation points large (and odd) enough to
    # exercise the 2-step "parallel" batch grid and the row-padding path.
    layer_sizes = [128, 256, 256, 64]
    batch = 200

    net = CustomNetPallas(layer_sizes, key)
    x = jax.random.normal(kx, (batch, layer_sizes[0]), jnp.float32)

    y = net(x)                       # bf16 MXU inputs, f32 accumulation/epilogue
    y = jax.block_until_ready(y)

    y_ref = net.reference(x)         # pure f32 reference
    assert y.shape == (batch, layer_sizes[-1])
    # bf16 matmul inputs => loosened tolerance vs the f32 reference.
    assert jnp.allclose(y, y_ref, atol=5e-2, rtol=5e-2), "mismatch vs reference"

    print("KERNEL_OK")
</pallas_src>

<mosaic_0001>
module attributes {stable_mosaic.version = 11 : i64} {
  func.func @_fused_mlp_kernel(%arg0: i32, %arg1: memref<104x128xf32, #tpu.memory_space<vmem>>, %arg2: memref<128x256xbf16, #tpu.memory_space<vmem>>, %arg3: memref<1x256xf32, #tpu.memory_space<vmem>>, %arg4: memref<256x256xbf16, #tpu.memory_space<vmem>>, %arg5: memref<1x256xf32, #tpu.memory_space<vmem>>, %arg6: memref<256x128xbf16, #tpu.memory_space<vmem>>, %arg7: memref<1x128xf32, #tpu.memory_space<vmem>>, %arg8: memref<104x128xf32, #tpu.memory_space<vmem>>) attributes {dimension_semantics = [#tpu.dimension_semantics<parallel>], iteration_bounds = array<i64: 2>, scalar_prefetch = 0 : i64, scratch_operands = 0 : i64, tpu.core_type = #tpu.core_type<tc>, window_params = [{transform_indices = @transform_0, window_bounds = array<i64: 104, 128>}, {pipeline_mode = #tpu.pipeline_mode<synchronous>, transform_indices = @transform_1, window_bounds = array<i64: 128, 256>}, {pipeline_mode = #tpu.pipeline_mode<synchronous>, transform_indices = @transform_2, window_bounds = array<i64: 1, 256>}, {pipeline_mode = #tpu.pipeline_mode<synchronous>, transform_indices = @transform_3, window_bounds = array<i64: 256, 256>}, {pipeline_mode = #tpu.pipeline_mode<synchronous>, transform_indices = @transform_4, window_bounds = array<i64: 1, 256>}, {pipeline_mode = #tpu.pipeline_mode<synchronous>, transform_indices = @transform_5, window_bounds = array<i64: 256, 128>}, {pipeline_mode = #tpu.pipeline_mode<synchronous>, transform_indices = @transform_6, window_bounds = array<i64: 1, 128>}, {transform_indices = @transform_7, window_bounds = array<i64: 104, 128>}]} {
    %c0 = arith.constant 0 : index
    %c0_0 = arith.constant 0 : index
    %0 = vector.load %arg1[%c0, %c0_0] : memref<104x128xf32, #tpu.memory_space<vmem>>, vector<104x128xf32>
    %c0_1 = arith.constant 0 : index
    %c0_2 = arith.constant 0 : index
    %1 = vector.load %arg2[%c0_1, %c0_2] : memref<128x256xbf16, #tpu.memory_space<vmem>>, vector<128x256xbf16>
    %c0_3 = arith.constant 0 : index
    %c0_4 = arith.constant 0 : index
    %2 = vector.load %arg3[%c0_3, %c0_4] : memref<1x256xf32, #tpu.memory_space<vmem>>, vector<1x256xf32>
    %3 = arith.truncf %0 : vector<104x128xf32> to vector<104x128xbf16>
    %cst = arith.constant dense<0.000000e+00> : vector<104x256xf32>
    %4 = tpu.matmul %3, %1, %cst {dimension_numbers = #tpu.dot_dimension_numbers<[1], [0], [0], [1], [0, 0, 1, 1], [], []>} : vector<104x128xbf16>, vector<128x256xbf16>, vector<104x256xf32> -> vector<104x256xf32>
    %5 = vector.broadcast %2 : vector<1x256xf32> to vector<104x256xf32>
    %6 = arith.addf %4, %5 : vector<104x256xf32>
    %cst_5 = arith.constant 0.000000e+00 : f32
    %7 = vector.broadcast %cst_5 : f32 to vector<104x256xf32>
    %8 = arith.maximumf %6, %7 : vector<104x256xf32>
    %c0_6 = arith.constant 0 : index
    %c0_7 = arith.constant 0 : index
    %9 = vector.load %arg4[%c0_6, %c0_7] : memref<256x256xbf16, #tpu.memory_space<vmem>>, vector<256x256xbf16>
    %c0_8 = arith.constant 0 : index
    %c0_9 = arith.constant 0 : index
    %10 = vector.load %arg5[%c0_8, %c0_9] : memref<1x256xf32, #tpu.memory_space<vmem>>, vector<1x256xf32>
    %11 = arith.truncf %8 : vector<104x256xf32> to vector<104x256xbf16>
    %cst_10 = arith.constant dense<0.000000e+00> : vector<104x256xf32>
    %12 = tpu.matmul %11, %9, %cst_10 {dimension_numbers = #tpu.dot_dimension_numbers<[1], [0], [0], [1], [0, 0, 1, 1], [], []>} : vector<104x256xbf16>, vector<256x256xbf16>, vector<104x256xf32> -> vector<104x256xf32>
    %13 = vector.broadcast %10 : vector<1x256xf32> to vector<104x256xf32>
    %14 = arith.addf %12, %13 : vector<104x256xf32>
    %cst_11 = arith.constant 0.000000e+00 : f32
    %15 = vector.broadcast %cst_11 : f32 to vector<104x256xf32>
    %16 = arith.maximumf %14, %15 : vector<104x256xf32>
    %c0_12 = arith.constant 0 : index
    %c0_13 = arith.constant 0 : index
    %17 = vector.load %arg6[%c0_12, %c0_13] : memref<256x128xbf16, #tpu.memory_space<vmem>>, vector<256x128xbf16>
    %c0_14 = arith.constant 0 : index
    %c0_15 = arith.constant 0 : index
    %18 = vector.load %arg7[%c0_14, %c0_15] : memref<1x128xf32, #tpu.memory_space<vmem>>, vector<1x128xf32>
    %19 = arith.truncf %16 : vector<104x256xf32> to vector<104x256xbf16>
    %cst_16 = arith.constant dense<0.000000e+00> : vector<104x128xf32>
    %20 = tpu.matmul %19, %17, %cst_16 {dimension_numbers = #tpu.dot_dimension_numbers<[1], [0], [0], [1], [0, 0, 1, 1], [], []>} : vector<104x256xbf16>, vector<256x128xbf16>, vector<104x128xf32> -> vector<104x128xf32>
    %21 = vector.broadcast %18 : vector<1x128xf32> to vector<104x128xf32>
    %22 = arith.addf %20, %21 : vector<104x128xf32>
    %c0_17 = arith.constant 0 : index
    %c0_18 = arith.constant 0 : index
    %23 = vector.load %arg8[%c0_17, %c0_18] : memref<104x128xf32, #tpu.memory_space<vmem>>, vector<104x128xf32>
    tpu.vector_store %arg8[%c0_17, %c0_18], %22 {strides = array<i32>} : memref<104x128xf32, #tpu.memory_space<vmem>>, vector<104x128xf32>,
    return
  }
  func.func @transform_0(%arg0: i32) -> (i32, i32) {
    %c0_i32 = arith.constant 0 : i32
    %c0_i32_0 = arith.constant 0 : i32
    return %arg0, %c0_i32 : i32, i32
  }
  func.func @transform_1(%arg0: i32) -> (i32, i32) {
    %c0_i32 = arith.constant 0 : i32
    %c0_i32_0 = arith.constant 0 : i32
    %c0_i32_1 = arith.constant 0 : i32
    return %c0_i32, %c0_i32_0 : i32, i32
  }
  func.func @transform_2(%arg0: i32) -> (i32, i32) {
    %c0_i32 = arith.constant 0 : i32
    %c0_i32_0 = arith.constant 0 : i32
    %c0_i32_1 = arith.constant 0 : i32
    return %c0_i32, %c0_i32_0 : i32, i32
  }
  func.func @transform_3(%arg0: i32) -> (i32, i32) {
    %c0_i32 = arith.constant 0 : i32
    %c0_i32_0 = arith.constant 0 : i32
    %c0_i32_1 = arith.constant 0 : i32
    return %c0_i32, %c0_i32_0 : i32, i32
  }
  func.func @transform_4(%arg0: i32) -> (i32, i32) {
    %c0_i32 = arith.constant 0 : i32
    %c0_i32_0 = arith.constant 0 : i32
    %c0_i32_1 = arith.constant 0 : i32
    return %c0_i32, %c0_i32_0 : i32, i32
  }
  func.func @transform_5(%arg0: i32) -> (i32, i32) {
    %c0_i32 = arith.constant 0 : i32
    %c0_i32_0 = arith.constant 0 : i32
    %c0_i32_1 = arith.constant 0 : i32
    return %c0_i32, %c0_i32_0 : i32, i32
  }
  func.func @transform_6(%arg0: i32) -> (i32, i32) {
    %c0_i32 = arith.constant 0 : i32
    %c0_i32_0 = arith.constant 0 : i32
    %c0_i32_1 = arith.constant 0 : i32
    return %c0_i32, %c0_i32_0 : i32, i32
  }
  func.func @transform_7(%arg0: i32) -> (i32, i32) {
    %c0_i32 = arith.constant 0 : i32
    %c0_i32_0 = arith.constant 0 : i32
    return %arg0, %c0_i32 : i32, i32
  }
}

</mosaic_0001>

<bundles_post_ra>
// kernel: tpu_custom_call.1
= control target key start
LH: loop header
LB: loop body
LE: loop exit
PB: predicated region body
PF: predicated region fallthrough
CT: control target
= control target key end

     0   :  { %s2379_s0 = inlined_call_operand.hbm [shape: f32[208,128], index: 0, kind: input, shape index: {}]   ;;  %s2380_s1 = inlined_call_operand.hbm [shape: bf16[128,256], index: 1, kind: input, shape index: {}]   ;;  %s2381_s2 = inlined_call_operand.hbm [shape: f32[1,256], index: 2, kind: input, shape index: {}]   ;;  %s2382_s3 = inlined_call_operand.hbm [shape: bf16[256,256], index: 3, kind: input, shape index: {}]   ;;  %s2383_s4 = inlined_call_operand.vmem [shape: f32[1,256], index: 4, kind: input, shape index: {}]   ;;  %s2384_s5 = inlined_call_operand.hbm [shape: bf16[256,128], index: 5, kind: input, shape index: {}]   ;;  %s2385_s6 = inlined_call_operand.vmem [shape: f32[1,128], index: 6, kind: input, shape index: {}]   ;;  %s2386_s7 = inlined_call_operand.hbm [shape: f32[208,128], index: 7, kind: output, shape index: {}]  }
   0x1   :  { %2389 = sst [smem:[#allocation16_spill]] %s2380_s1 }
   0x2   :  { %2390 = sst [smem:[#allocation17_spill]] %s2381_s2 }
   0x3   :  { %2391 = sst [smem:[#allocation18_spill]] %s2382_s3 }
   0x4   :  { %12 = vsyncpa [#allocation3], 0 }
   0x5   :  { %14 = vsyncpa [#allocation3 + $0x1], 0 }
   0x6   :  { %15 = vsyncpa [#allocation6], 0 }
   0x7   :  { %16 = vsyncpa [#allocation9], 0 }
   0x8   :  { %17 = vsyncpa [#allocation4], 0 }
   0x9   :  { %19 = vsyncpa [#allocation4 + $0x1], 0  ;;  %s2091_s24 = smov 0   ;;  %s2093_s25 = smov 0  }
   0xa   :  { %s2095_s26 = smov 0   ;;  %s2097_s27 = smov 0  }
   0xb LB: > { %s2112_s28 = sadd.s32 4294967295, %s2039_s27   ;;  %s1381_s29 = sadd.s32 4294967294, %s2039_s27   ;;  %s2039_s27 = sphi %s2097_s27, %s2407_s27   ;;  %s2035_s26 = sphi %s2095_s26, %s2406_s26   ;;  %s2031_s25 = sphi %s2093_s25, %s2405_s25   ;;  %s2027_s24 = sphi %s2091_s24, %s2404_s24  }
   0xc   : > { %p45_p0 = scmp.ne.s32.totalorder %s2031_s25, %s2027_s24  ;;  %p46_p1 = scmp.eq.s32.totalorder %s2112_s28, 0 }
   0xd   : > { %p195_p2 = scmp.eq.s32.totalorder %s2112_s28, 1  ;;  %p201_p3 = scmp.eq.s32.totalorder %s1381_s29, 1 }
   0xe   : > { %p2121_p4 = por %p46_p1, %p45_p0  ;;  %p1382_p5 = scmp.ge.s32.totalorder %s2039_s27, 1 }
   0xf   : > { %p2126_p6 = por %p201_p3, %p45_p0  ;;  %p208_p7 = scmp.lt.s32.totalorder %s2039_s27, 3 }
  0x10   : > { %s2394_s1 = sld [smem:[#allocation16_spill]]  ;;  %s2041_s13 = smov [#allocation5]  }
  0x11   : > { %p2134_p8 = pnand %p1382_p5, %p208_p7  ;;  %s221_s14 = sshll.u32 %s2041_s13, 4  ;;  %s222_s14 = int_to_ptr.vmem [resolvable:$true] %s221_s14 }
  0x12   : > { %s2397_s3 = sld [smem:[#allocation18_spill]]  ;;  %s2387_s19 = smov 128  }
  0x13   : > { %p1741_p9 = pneg %p2134_p8  ;;  %s2388_s20 = smov 8  }
  0x14   : > { %s2044_s21 = smov [#allocation8]   ;;  %s2398_s2 = sld [smem:[#allocation17_spill]] }
  0x15   : > { %p2142_p10 = pnand %p1741_p9, %p46_p1  ;;  %s247_s22 = sshll.u32 %s2044_s21, 4  ;;  %s248_s22 = int_to_ptr.vmem [resolvable:$true] %s247_s22 }
  0x16   : > { %s219_s11 = sshll.u32 %s2394_s1, 4  ;;  %s2046_s17 = smov [#allocation10]   ;;  %s220_s11 = int_to_ptr.hbm [resolvable:$true] %s219_s11 }
  0x17   : > { %1744 = dma.hbm_to_vmem [thread:$0]  (!%p2142_p10), %s220_s11, 2048, %s222_s14, [#allocation6], %s2387_s19, %s2387_s19, %s2388_s20  }
  0x18   : > { %s245_s18 = sshll.u32 %s2397_s3, 4  ;;  %s262_s11 = sshll.u32 %s2384_s5, 4  ;;  %s246_s18 = int_to_ptr.hbm [resolvable:$true] %s245_s18  ;;  %s263_s11 = int_to_ptr.hbm [resolvable:$true] %s262_s11 }
  0x19   : > { %1750 = dma.hbm_to_vmem [thread:$0]  (!%p2142_p10), %s246_s18, 4096, %s248_s22, [#allocation9], %s2387_s19, %s2387_s19, %s2388_s20  }
  0x1a   : > { %s234_s9 = sshll.u32 %s2398_s2, 4  ;;  %s2045_s14 = smov [#allocation7]   ;;  %s235_s9 = int_to_ptr.hbm [resolvable:$true] %s234_s9 }
  0x1b   : > { %s236_s16 = sshll.u32 %s2045_s14, 4  ;;  %s264_s18 = sshll.u32 %s2046_s17, 4  ;;  %s237_s16 = int_to_ptr.vmem [resolvable:$true] %s236_s16  ;;  %s265_s18 = int_to_ptr.vmem [resolvable:$true] %s264_s18 }
  0x1c   : > { %1747 = dma.hbm_to_vmem [thread:$0]  (!%p2142_p10), %s235_s9, 32, %s237_s16, [#allocation6]  }
  0x1d   : > { %s2047_s21 = smov 64   ;;  %s2048_s22 = smov 4  }
  0x1e   : > { %1753 = dma.hbm_to_vmem [thread:$0]  (!%p2142_p10), %s263_s11, 2048, %s265_s18, [#allocation9], %s2047_s21, %s2047_s21, %s2048_s22  }
  0x1f   : > { %s2171_s23 = sadd.s32 1, %s2039_s27   ;;  %s32_s10 = sadd.s32 1, %s2035_s26 }
  0x20   : > { %s29_s29 = ssub.s32 %s2039_s27, %s2171_s23  ;;  %p39_p13 = scmp.ne.s32.totalorder %s2035_s26, %s2031_s25 }
  0x21   : > { %p30_p12 = scmp.eq.s32.totalorder %s29_s29, 0  ;;  %p40_p0 = scmp.eq.s32.totalorder %s2039_s27, 0 }
  0x22   : > { %p2184_p5 = por %p195_p2, %p39_p13  ;;  %p1766_p7 = scmp.lt.s32.totalorder %s2039_s27, 2 }
  0x23   : > { %s2180_s13 = scalar_select %p30_p12, %s2035_s26, %s32_s10  }
  0x24   : > { %p41_p3 = por %p40_p0, %p39_p13  ;;  %s281_s14 = sand.u32 1, %s2035_s26  }
  0x25   : > { %s1719_s15 = smul.u32 104, %s281_s14  ;;  %s282_s19 = scalar_lea.sflag [#allocation3], %s281_s14 }
  0x26   : > { %s1653_s11 = smul.u32 104, %s2039_s27  ;;  %p2191_p9 = pnand %p1766_p7, %p41_p3 }
  0x27   : > { %s285_s22 = scalar_lea.vmem [#allocation2], %s1719_s15  ;;  %s1942_s17 = scalar_lea.hbm %s2379_s0, 208 }
  0x28   : > { %s290_s21 = scalar_lea.hbm %s2379_s0, %s1653_s11  ;;  %s293_s29 = sshll.u32 %s285_s22, 4  ;;  %s294_s29 = int_to_ptr.vmem [resolvable:$true] %s293_s29 }
  0x29   : > { %s291_s10 = sshll.u32 %s290_s21, 4  ;;  %p1939_p10 = pneg %p2191_p9  ;;  %s292_s10 = int_to_ptr.hbm [resolvable:$true] %s291_s10 }
  0x2a   : > { %s1935_s20 = sshra.s32 %s292_s10, 4  ;;  %s1936_s20 = int_to_ptr.hbm [resolvable:$true] %s1935_s20 }
  0x2b   : > { %s1937_s1 = scalar_lea.hbm %s1936_s20, 104  ;;  %p1943_p0 = scmp.lt.s32.totalorder %s1936_s20, %s2379_s0 }
  0x2c   : > { %p1938_p2 = scmp.ne.s32.totalorder %s1936_s20, %s1937_s1  ;;  %p1944_p3 = scmp.lt.s32.totalorder %s1942_s17, %s1937_s1 }
  0x2e   : > { %p1940_p12 = pnand %p1939_p10, %p1938_p2  ;;  %p1945_p7 = por %p1944_p3, %p1943_p0 }
  0x30   : > { %p1941_p13 = pneg %p1940_p12 }
  0x32   : > { %p1946_p11 = pnand %p1945_p7, %p1941_p13 }
  0x34   : > { %1949 = shalt.err (!%p1946_p11)
}
  0x35   : > { %s2401_s14 = smov 8   ;;  %s2402_s15 = smov 128  }
  0x36   : > { %1757 = dma.hbm_to_vmem [thread:$0]  (!%p2191_p9), %s292_s10, 1664, %s294_s29, %s282_s19, %s2402_s15, %s2402_s15, %s2401_s14  }
  0x37   : > { %305 = sbr.rel (%p2134_p8) target bundleno = 623 (0x26f), region = 48  ;;  %s2214_s2 = sand.u32 (!%p2134_p8), 1, %s2031_s25  }
  0x38   : > { %s1720_s1 = smul.u32 (!%p2134_p8), 104, %s2214_s2  ;;  %s308_s3 = scalar_lea.sflag (!%p2134_p8), [#allocation3], %s2214_s2 }
  0x3a   : > { %s2220_s20 = scalar_lea.vmem (!%p2134_p8), [#allocation2], %s1720_s1 }
  0x3c   : > { %2010 = dma.done.wait (%p2121_p4), %s308_s3, 1664  }
  0x3d   : > { %2012 = vsyncadd (%p2121_p4), %s308_s3, 4294965632 }
  0x3e   : > { %2014 = dma.done.wait (%p46_p1), [#allocation6], 2080  }
  0x3f   : > { %2016 = vsyncadd (%p46_p1), [#allocation6], 4294965216 }
  0x40   : > { %2018 = dma.done.wait (%p46_p1), [#allocation9], 6144  }
  0x41   : > { %2020 = vsyncadd (%p46_p1), [#allocation9], 4294961152  ;;  %v1452_v0 = vld [vmem:[#allocation5 + $0x70] sm:$0xf]  ;;  %v1669_v1 = vld [vmem:[#allocation5 + $0x74] sm:$0xf0] }
  0x42   : > { %v1668_v2 = vld [vmem:[#allocation5 + $0x74] sm:$0xf]  ;;  %v1453_v3 = vor.u32 %v1669_v1, %v1452_v0  ;;  %v1454_v4 = vld [vmem:[#allocation5 + $0x78] sm:$0xf0]  ;;  %v1444_v5 = vld [vmem:[#allocation5 + $0x60] sm:$0xf] }
  0x43   : > { %v1667_v6 = vld [vmem:[#allocation5 + $0x64] sm:$0xf0]  ;;  %v1457_v7 = vor.u32 %v1668_v2, %v1454_v4  ;;  %v1666_v8 = vld [vmem:[#allocation5 + $0x64] sm:$0xf]  ;;  %v1446_v9 = vld [vmem:[#allocation5 + $0x68] sm:$0xf0] }
  0x44   : > { %487 = vmatpush.bf16.msra.mxu0 %v1453_v3  ;;  %v1445_v10 = vor.u32 %v1667_v6, %v1444_v5  ;;  %v1449_v11 = vor.u32 %v1666_v8, %v1446_v9  ;;  %v1436_v12 = vld [vmem:[#allocation5 + $0x50] sm:$0xf]  ;;  %v1665_v13 = vld [vmem:[#allocation5 + $0x54] sm:$0xf0]  ;;  %v1664_v14 = vld [vmem:[#allocation5 + $0x54] sm:$0xf] }
  0x45   : > { %530 = vmatpush.bf16.msra.mxu1 %v1457_v7  ;;  %v1438_v15 = vld [vmem:[#allocation5 + $0x58] sm:$0xf0]  ;;  %v1437_v16 = vor.u32 %v1665_v13, %v1436_v12  ;;  %v1428_v18 = vld [vmem:[#allocation5 + $0x40] sm:$0xf]  ;;  %v1663_v19 = vld [vmem:[#allocation5 + $0x44] sm:$0xf0] }
  0x46   : > { %v1441_v17 = vor.u32 %v1664_v14, %v1438_v15  ;;  %v1662_v20 = vld [vmem:[#allocation5 + $0x44] sm:$0xf]  ;;  %v1430_v21 = vld [vmem:[#allocation5 + $0x48] sm:$0xf0]  ;;  %v1429_v22 = vor.u32 %v1663_v19, %v1428_v18  ;;  %v1420_v24 = vld [vmem:[#allocation5 + $0x30] sm:$0xf] }
  0x47   : > { %v1433_v23 = vor.u32 %v1662_v20, %v1430_v21  ;;  %v1661_v25 = vld [vmem:[#allocation5 + $0x34] sm:$0xf0]  ;;  %v1660_v26 = vld [vmem:[#allocation5 + $0x34] sm:$0xf]  ;;  %v1422_v27 = vld [vmem:[#allocation5 + $0x38] sm:$0xf0] }
  0x48   : > { %488 = vmatpush.bf16.msra.mxu0 %v1445_v10  ;;  %v1421_v28 = vor.u32 %v1661_v25, %v1420_v24  ;;  %v1425_v29 = vor.u32 %v1660_v26, %v1422_v27  ;;  %v1412_v30 = vld [vmem:[#allocation5 + $0x20] sm:$0xf]  ;;  %v1659_v31 = vld [vmem:[#allocation5 + $0x24] sm:$0xf0]  ;;  %v1658_v32 = vld [vmem:[#allocation5 + $0x24] sm:$0xf] }
  0x49   : > { %531 = vmatpush.bf16.msra.mxu1 %v1449_v11  ;;  %v1414_v33 = vld [vmem:[#allocation5 + $0x28] sm:$0xf0]  ;;  %v1413_v34 = vor.u32 %v1659_v31, %v1412_v30  ;;  %v1404_v36 = vld [vmem:[#allocation5 + $0x10] sm:$0xf]  ;;  %v1657_v37 = vld [vmem:[#allocation5 + $0x14] sm:$0xf0] }
  0x4a   : > { %v1417_v35 = vor.u32 %v1658_v32, %v1414_v33  ;;  %v1656_v38 = vld [vmem:[#allocation5 + $0x14] sm:$0xf]  ;;  %v1406_v39 = vld [vmem:[#allocation5 + $0x18] sm:$0xf0]  ;;  %v1405_v40 = vor.u32 %v1657_v37, %v1404_v36  ;;  %v1396_v42 = vld [vmem:[#allocation5] sm:$0xf] }
  0x4b   : > { %v1409_v41 = vor.u32 %v1656_v38, %v1406_v39  ;;  %v1655_v43 = vld [vmem:[#allocation5 + $0x4] sm:$0xf0]  ;;  %v1654_v44 = vld [vmem:[#allocation5 + $0x4] sm:$0xf]  ;;  %v1398_v45 = vld [vmem:[#allocation5 + $0x8] sm:$0xf0] }
  0x4c   : > { %489 = vmatpush.bf16.msra.mxu0 %v1437_v16  ;;  %v1397_v46 = vor.u32 %v1655_v43, %v1396_v42  ;;  %v365_v47 = vld [vmem:[%s2220_s20] sm:$0xff]  ;;  %v366_v48 = vld [vmem:[%s2220_s20 + $0x8] sm:$0xff]  ;;  %v1401_v49 = vor.u32 %v1654_v44, %v1398_v45  ;;  %v367_v57 = vld [vmem:[%s2220_s20 + $0x10] sm:$0xff]  ;;  %s2318_s21 = scalar_lea.vmem [#allocation11], %s1720_s1  ;;  %s1718_s22 = smul.u32 104, %s2112_s28 }
  0x4d   : > { %532 = vmatpush.bf16.msra.mxu1 %v1441_v17  ;;  %v395_v50 = vpack.c.bf16 %v366_v48, %v365_v47  ;;  %v1684_v51 = vld [vmem:[#allocation8 + $0x74] sm:$0xf]  ;;  %v1518_v52 = vld [vmem:[#allocation8 + $0x78] sm:$0xf0]  ;;  %v1682_v60 = vld [vmem:[#allocation8 + $0x64] sm:$0xf] }
  0x4e   : > { %v1700_v53 = vld [vmem:[#allocation8 + $0xf4] sm:$0xf]  ;;  %v1521_v54 = vor.u32 %v1684_v51, %v1518_v52  ;;  %v1582_v55 = vld [vmem:[#allocation8 + $0xf8] sm:$0xf0]  ;;  %v1510_v61 = vld [vmem:[#allocation8 + $0x68] sm:$0xf0]  ;;  %s1266_s17 = scalar_lea.hbm %s2386_s7, %s1718_s22 }
  0x4f   : > { %v1585_v56 = vor.u32 %v1700_v53, %v1582_v55  ;;  %v368_v58 = vld [vmem:[%s2220_s20 + $0x18] sm:$0xff]  ;;  %v1513_v63 = vor.u32 %v1682_v60, %v1510_v61  ;;  %v1502_v2 = vld [vmem:[#allocation8 + $0x58] sm:$0xf0]  ;;  %v1685_v36 = vld [vmem:[#allocation8 + $0x74] sm:$0xf0]  ;;  %s1267_s18 = sshll.u32 %s2318_s21, 4  ;;  %s1268_s18 = int_to_ptr.vmem [resolvable:$true] %s1267_s18 }
  0x50   : > { %490 = vmatpush.bf16.msra.mxu0 %v1429_v22  ;;  %v396_v59 = vpack.c.bf16 %v368_v58, %v367_v57  ;;  %v1698_v62 = vld [vmem:[#allocation8 + $0xe4] sm:$0xf]  ;;  %v1574_v0 = vld [vmem:[#allocation8 + $0xe8] sm:$0xf0]  ;;  %v1680_v1 = vld [vmem:[#allocation8 + $0x54] sm:$0xf] }
  0x51   : > { %533 = vmatpush.bf16.msra.mxu1 %v1433_v23  ;;  %v1577_v3 = vor.u32 %v1698_v62, %v1574_v0  ;;  %v1505_v4 = vor.u32 %v1680_v1, %v1502_v2  ;;  %v369_v5 = vld [vmem:[%s2220_s20 + $0x20] sm:$0xff]  ;;  %v370_v6 = vld [vmem:[%s2220_s20 + $0x28] sm:$0xff]  ;;  %v371_v17 = vld [vmem:[%s2220_s20 + $0x30] sm:$0xff]  ;;  %s1269_s11 = sshll.u32 %s1266_s17, 4  ;;  %s1255_s28 = scalar_lea.sflag [#allocation4], %s2214_s2  ;;  %s1270_s11 = int_to_ptr.hbm [resolvable:$true] %s1269_s11 }
  0x52   : > { %v397_v7 = vpack.c.bf16 %v370_v6, %v369_v5  ;;  %v1696_v8 = vld [vmem:[#allocation8 + $0xd4] sm:$0xf]  ;;  %v1566_v9 = vld [vmem:[#allocation8 + $0xd8] sm:$0xf0]  ;;  %v1678_v10 = vld [vmem:[#allocation8 + $0x44] sm:$0xf] }
  0x53   : > { %v1569_v11 = vor.u32 %v1696_v8, %v1566_v9  ;;  %v1494_v12 = vld [vmem:[#allocation8 + $0x48] sm:$0xf0]  ;;  %v1694_v13 = vld [vmem:[#allocation8 + $0xc4] sm:$0xf]  ;;  %v1676_v20 = vld [vmem:[#allocation8 + $0x34] sm:$0xf] }
  0x54   : > { %491 = vmatpush.bf16.msra.mxu0 %v1421_v28  ;;  %v1558_v14 = vld [vmem:[#allocation8 + $0xc8] sm:$0xf0]  ;;  %v1497_v15 = vor.u32 %v1678_v10, %v1494_v12  ;;  %v1486_v21 = vld [vmem:[#allocation8 + $0x38] sm:$0xf0]  ;;  %v1692_v22 = vld [vmem:[#allocation8 + $0xb4] sm:$0xf] }
  0x55   : > { %534 = vmatpush.bf16.msra.mxu1 %v1425_v29  ;;  %v1561_v16 = vor.u32 %v1694_v13, %v1558_v14  ;;  %v372_v18 = vld [vmem:[%s2220_s20 + $0x38] sm:$0xff]  ;;  %v1489_v23 = vor.u32 %v1676_v20, %v1486_v21  ;;  %v1550_v24 = vld [vmem:[#allocation8 + $0xb8] sm:$0xf0]  ;;  %v1701_v38 = vld [vmem:[#allocation8 + $0xf4] sm:$0xf0]  ;;  %s1979_s14 = sshra.s32 %s1270_s11, 4  ;;  %s1980_s14 = int_to_ptr.hbm [resolvable:$true] %s1979_s14 }
  0x56   : > { %v398_v19 = vpack.c.bf16 %v372_v18, %v371_v17  ;;  %v1553_v25 = vor.u32 %v1692_v22, %v1550_v24  ;;  %v373_v26 = vld [vmem:[%s2220_s20 + $0x40] sm:$0xff]  ;;  %v374_v27 = vld [vmem:[%s2220_s20 + $0x48] sm:$0xff]  ;;  %v1683_v42 = vld [vmem:[#allocation8 + $0x64] sm:$0xf0]  ;;  %s1981_s15 = scalar_lea.hbm %s1980_s14, 104  ;;  %p1986_p11 = scmp.lt.s32.totalorder %s1980_s14, %s2386_s7 }
  0x57   : > { %v399_v28 = vpack.c.bf16 %v374_v27, %v373_v26  ;;  %v1674_v29 = vld [vmem:[#allocation8 + $0x24] sm:$0xf]  ;;  %v1478_v30 = vld [vmem:[#allocation8 + $0x28] sm:$0xf0]  ;;  %v1580_v37 = vld [vmem:[#allocation8 + $0xf0] sm:$0xf]  ;;  %p1982_p1 = scmp.ne.s32.totalorder %s1980_s14, %s1981_s15 }
  0x58   : > { %492 = vmatpush.bf16.msra.mxu0 %v1413_v34  ;;  %v1481_v31 = vor.u32 %v1674_v29, %v1478_v30  ;;  %v1690_v32 = vld [vmem:[#allocation8 + $0xa4] sm:$0xf]  ;;  %v1542_v33 = vld [vmem:[#allocation8 + $0xa8] sm:$0xf0]  ;;  %v1516_v34 = vld [vmem:[#allocation8 + $0x70] sm:$0xf] }
  0x59   : > { %535 = vmatpush.bf16.msra.mxu1 %v1417_v35  ;;  %v1545_v35 = vor.u32 %v1690_v32, %v1542_v33  ;;  %v1517_v39 = vor.u32 %v1685_v36, %v1516_v34  ;;  %v1572_v43 = vld [vmem:[#allocation8 + $0xe0] sm:$0xf]  ;;  %v1699_v44 = vld [vmem:[#allocation8 + $0xe4] sm:$0xf0]  ;;  %v1500_v45 = vld [vmem:[#allocation8 + $0x50] sm:$0xf]  ;;  %p1983_p4 = pnand %p1982_p1, %p2184_p5 }
  0x5a   : > { %v1573_v48 = vor.u32 %v1699_v44, %v1572_v43  ;;  %v1672_v51 = vld [vmem:[#allocation8 + $0x14] sm:$0xf]  ;;  %v1470_v52 = vld [vmem:[#allocation8 + $0x18] sm:$0xf0]  ;;  %v1492_v61 = vld [vmem:[#allocation8 + $0x40] sm:$0xf] }
  0x5b   : > { %811 = vmatpush.bf16.msra.mxu2 %v1517_v39  ;;  %v1688_v53 = vld [vmem:[#allocation8 + $0x94] sm:$0xf]  ;;  %v1473_v55 = vor.u32 %v1672_v51, %v1470_v52  ;;  %v375_v57 = vld [vmem:[%s2220_s20 + $0x50] sm:$0xff]  ;;  %v1484_v5 = vld [vmem:[#allocation8 + $0x30] sm:$0xf]  ;;  %p1984_p8 = pneg %p1983_p4 }
  0x5c   : > { %493 = vmatpush.bf16.msra.mxu0 %v1405_v40  ;;  %v1581_v40 = vor.u32 %v1701_v38, %v1580_v37  ;;  %v376_v58 = vld [vmem:[%s2220_s20 + $0x58] sm:$0xff]  ;;  %v1677_v6 = vld [vmem:[#allocation8 + $0x34] sm:$0xf0]  ;;  %v1476_v12 = vld [vmem:[#allocation8 + $0x20] sm:$0xf] }
  0x5d   : > { %536 = vmatpush.bf16.msra.mxu1 %v1409_v41  ;;  %v1508_v41 = vld [vmem:[#allocation8 + $0x60] sm:$0xf]  ;;  %v1679_v62 = vld [vmem:[#allocation8 + $0x44] sm:$0xf0]  ;;  %v400_v1 = vpack.c.bf16 %v376_v58, %v375_v57  ;;  %v1485_v9 = vor.u32 %v1677_v6, %v1484_v5  ;;  %v1693_v10 = vld [vmem:[#allocation8 + $0xb4] sm:$0xf0] }
  0x5e   : > { %854 = vmatpush.bf16.msra.mxu3 %v1581_v40  ;;  %v1509_v47 = vor.u32 %v1683_v42, %v1508_v41  ;;  %v1695_v0 = vld [vmem:[#allocation8 + $0xc4] sm:$0xf0]  ;;  %v1493_v2 = vor.u32 %v1679_v62, %v1492_v61  ;;  %v1670_v18 = vld [vmem:[#allocation8 + $0x4] sm:$0xf]  ;;  %v1468_v21 = vld [vmem:[#allocation8 + $0x10] sm:$0xf] }
  0x5f   : > { %v1675_v13 = vld [vmem:[#allocation8 + $0x24] sm:$0xf0]  ;;  %v1673_v22 = vld [vmem:[#allocation8 + $0x14] sm:$0xf0]  ;;  %v1686_v27 = vld [vmem:[#allocation8 + $0x84] sm:$0xf] }
  0x60   : > { %494 = vmatpush.bf16.msra.mxu0 %v1397_v46  ;;  %v1681_v46 = vld [vmem:[#allocation8 + $0x54] sm:$0xf0]  ;;  %812 = vmatpush.bf16.msra.mxu2 %v1509_v47  ;;  %v1477_v14 = vor.u32 %v1675_v13, %v1476_v12  ;;  %v1469_v24 = vor.u32 %v1673_v22, %v1468_v21  ;;  %v1460_v29 = vld [vmem:[#allocation8] sm:$0xf]  ;;  %v1687_v33 = vld [vmem:[#allocation8 + $0x84] sm:$0xf0] }
  0x61   : > { %537 = vmatpush.bf16.msra.mxu1 %v1401_v49  ;;  %v1564_v49 = vld [vmem:[#allocation8 + $0xd0] sm:$0xf]  ;;  %v1524_v32 = vld [vmem:[#allocation8 + $0x80] sm:$0xf]  ;;  %v394_v36 = vld [vmem:[#allocation7] sm:$0x3] }
  0x62   : > { %855 = vmatpush.bf16.msra.mxu3 %v1573_v48  ;;  %v2247_v39 = vperm.slane %v394_v36, 0  ;;  %v2249_v40 = vperm.slane %v394_v36, 1  ;;  %v1707_v22 = vld [vmem:[#allocation10 + $0x28] sm:$0xff]  ;;  %v1714_v36 = vld [vmem:[#allocation10 + $0x60] sm:$0xff] }
  0x63   : > { %495 = vmatmul.bf16.vlgmr.msra.gmra.mxu0 %v395_v50 }
  0x64   : > { %538 = vmatmul.bf16.vlgmr.msra.gmra.mxu1 %v395_v50  ;;  %897 = vmatpush.bf16.msrb.mxu0 %v1521_v54  ;;  %v1697_v50 = vld [vmem:[#allocation8 + $0xd4] sm:$0xf0]  ;;  %v1534_v54 = vld [vmem:[#allocation8 + $0x98] sm:$0xf0] }
  0x65   : > { %940 = vmatpush.bf16.msrb.mxu1 %v1585_v56  ;;  %v1537_v56 = vor.u32 %v1688_v53, %v1534_v54  ;;  %v1565_v60 = vor.u32 %v1697_v50, %v1564_v49 }
  0x67   : > { %856 = vmatpush.bf16.msra.mxu3 %v1565_v60 }
  0x68   : > { %898 = vmatpush.bf16.msrb.mxu0 %v1513_v63  ;;  %v1556_v63 = vld [vmem:[#allocation8 + $0xc0] sm:$0xf] }
  0x69   : > { %941 = vmatpush.bf16.msrb.mxu1 %v1577_v3  ;;  %v1557_v3 = vor.u32 %v1695_v0, %v1556_v63 }
  0x6b   : > { %857 = vmatpush.bf16.msra.mxu3 %v1557_v3 }
  0x6c   : > { %899 = vmatpush.bf16.msrb.mxu0 %v1505_v4  ;;  %v377_v4 = vld [vmem:[%s2220_s20 + $0x60] sm:$0xff]  ;;  %s1985_s20 = scalar_lea.hbm %s2386_s7, 208 }
  0x6d   : > { %942 = vmatpush.bf16.msrb.mxu1 %v1569_v11  ;;  %v401_v8 = vpack.c.bf16 %v377_v4, %v377_v4  ;;  %p1987_p9 = scmp.lt.s32.totalorder %s1985_s20, %s1981_s15 }
  0x6f   : > { %p1988_p2 = por %p1987_p9, %p1986_p11 }
  0x70   : > { %900 = vmatpush.bf16.msrb.mxu0 %v1497_v15  ;;  %v1540_v15 = vld [vmem:[#allocation8 + $0xa0] sm:$0xf] }
  0x71   : > { %943 = vmatpush.bf16.msrb.mxu1 %v1561_v16  ;;  %v1691_v16 = vld [vmem:[#allocation8 + $0xa4] sm:$0xf0]  ;;  %p1989_p10 = pnand %p1988_p2, %p1984_p8 }
  0x72   : > { %v1541_v17 = vor.u32 %v1691_v16, %v1540_v15 }
  0x73   : > { %500 = vmatmul.bf16.gmra.mxu0 %v396_v59 }
  0x74   : > { %543 = vmatmul.bf16.gmra.mxu1 %v396_v59  ;;  %901 = vmatpush.bf16.msrb.mxu0 %v1489_v23  ;;  %v1501_v59 = vor.u32 %v1681_v46, %v1500_v45  ;;  %v1532_v23 = vld [vmem:[#allocation8 + $0x90] sm:$0xf] }
  0x75   : > { %944 = vmatpush.bf16.msrb.mxu1 %v1553_v25  ;;  %v1689_v25 = vld [vmem:[#allocation8 + $0x94] sm:$0xf0] }
  0x76   : > { %813 = vmatpush.bf16.msra.mxu2 %v1501_v59  ;;  %v1533_v26 = vor.u32 %v1689_v25, %v1532_v23  ;;  %v1715_v23 = vld [vmem:[#allocation10 + $0x68] sm:$0xff] }
  0x78   : > { %902 = vmatpush.bf16.msrb.mxu0 %v1481_v31  ;;  %v1671_v31 = vld [vmem:[#allocation8 + $0x4] sm:$0xf0] }
  0x79   : > { %945 = vmatpush.bf16.msrb.mxu1 %v1545_v35  ;;  %v1461_v34 = vor.u32 %v1671_v31, %v1460_v29  ;;  %v1525_v35 = vor.u32 %v1687_v33, %v1524_v32 }
  0x7a   : > { %814 = vmatpush.bf16.msra.mxu2 %v1493_v2 }
  0x7c   : > { %903 = vmatpush.bf16.msrb.mxu0 %v1473_v55  ;;  %v1709_v55 = vld [vmem:[#allocation10 + $0x38] sm:$0xff] }
  0x7d   : > { %946 = vmatpush.bf16.msrb.mxu1 %v1537_v56  ;;  %v1717_v56 = vld [vmem:[#allocation10 + $0x78] sm:$0xff] }
  0x7e   : > { %815 = vmatpush.bf16.msra.mxu2 %v1485_v9 }
  0x82   : > { %816 = vmatpush.bf16.msra.mxu2 %v1477_v14 }
  0x83   : > { %505 = vmatmul.bf16.gmra.mxu0 %v397_v7 }
  0x84   : > { %548 = vmatmul.bf16.gmra.mxu1 %v397_v7  ;;  %v1548_v7 = vld [vmem:[#allocation8 + $0xb0] sm:$0xf] }
  0x85   : > { %v1549_v11 = vor.u32 %v1693_v10, %v1548_v7  ;;  %v1708_v7 = vld [vmem:[#allocation10 + $0x30] sm:$0xff] }
  0x86   : > { %817 = vmatpush.bf16.msra.mxu2 %v1469_v24 }
  0x87   : > { %858 = vmatpush.bf16.msra.mxu3 %v1549_v11 }
  0x8a   : > { %818 = vmatpush.bf16.msra.mxu2 %v1461_v34 }
  0x8b   : > { %859 = vmatpush.bf16.msra.mxu3 %v1541_v17 }
  0x8e   : > { %1155 = vmatpush.bf16.msrb.mxu2 %v1709_v55 }
  0x8f   : > { %860 = vmatpush.bf16.msra.mxu3 %v1533_v26 }
  0x92   : > { %1156 = vmatpush.bf16.msrb.mxu2 %v1708_v7 }
  0x93   : > { %510 = vmatmul.bf16.gmra.mxu0 %v398_v19  ;;  %861 = vmatpush.bf16.msra.mxu3 %v1525_v35  ;;  %v1706_v35 = vld [vmem:[#allocation10 + $0x20] sm:$0xff] }
  0x94   : > { %553 = vmatmul.bf16.gmra.mxu1 %v398_v19  ;;  %v1462_v19 = vld [vmem:[#allocation8 + $0x8] sm:$0xf0] }
  0x95   : > { %v1465_v20 = vor.u32 %v1670_v18, %v1462_v19 }
  0x96   : > { %1157 = vmatpush.bf16.msrb.mxu2 %v1707_v22  ;;  %v1702_v22 = vld [vmem:[#allocation10] sm:$0xff] }
  0x97   : > { %904 = vmatpush.bf16.msrb.mxu0 %v1465_v20  ;;  %1198 = vmatpush.bf16.msrb.mxu3 %v1717_v56 }
  0x9a   : > { %1158 = vmatpush.bf16.msrb.mxu2 %v1706_v35 }
  0xa3   : > { %515 = vmatmul.bf16.gmra.mxu0 %v399_v28 }
  0xa4   : > { %558 = vmatmul.bf16.gmra.mxu1 %v399_v28  ;;  %v1526_v28 = vld [vmem:[#allocation8 + $0x88] sm:$0xf0] }
  0xa5   : > { %v1529_v30 = vor.u32 %v1686_v27, %v1526_v28 }
  0xa7   : > { %947 = vmatpush.bf16.msrb.mxu1 %v1529_v30 }
  0xb3   : > { %520 = vmatmul.bf16.gmra.mxu0 %v400_v1 }
  0xb4   : > { %563 = vmatmul.bf16.gmra.mxu1 %v400_v1 }
  0xc3   : > { %525 = vmatmul.bf16.gmra.mxu0 %v401_v8 }
  0xc4   : > { %568 = vmatmul.bf16.gmra.mxu1 %v401_v8  ;;  %v1716_v8 = vld [vmem:[#allocation10 + $0x70] sm:$0xff] }
  0xc5   : > { %1199 = vmatpush.bf16.msrb.mxu3 %v1716_v8 }
  0xc9   : > { %1200 = vmatpush.bf16.msrb.mxu3 %v1715_v23 }
  0xcd   : > { %1201 = vmatpush.bf16.msrb.mxu3 %v1714_v36 }
  0xe0   : > { %v496_v37 = vpop.f32.mrf.mxu0 }
  0xe1   : > { %v539_v38 = vpop.f32.mrf.mxu1  ;;  %v497_v41 = vadd.f32 %v496_v37, %v2247_v39 }
  0xe2   : > { %v540_v42 = vadd.f32 %v539_v38, %v2249_v40 }
  0xe3   : > { %v573_v47 = vmax.f32 %v497_v41, 0.0 }
  0xe4   : > { %v574_v49 = vmax.f32 %v540_v42, 0.0 }
  0xe8   : > { %v498_v43 = vpop.f32.mrf.mxu0 }
  0xe9   : > { %v499_v44 = vadd.f32 %v498_v43, %v2247_v39  ;;  %v541_v45 = vpop.f32.mrf.mxu1  ;;  %v1705_v43 = vld [vmem:[#allocation10 + $0x18] sm:$0xff] }
  0xea   : > { %v542_v46 = vadd.f32 %v541_v45, %v2249_v40  ;;  %1159 = vmatpush.bf16.msrb.mxu2 %v1705_v43 }
  0xeb   : > { %v575_v48 = vmax.f32 %v499_v44, 0.0  ;;  %v1713_v44 = vld [vmem:[#allocation10 + $0x58] sm:$0xff] }
  0xec   : > { %v576_v50 = vmax.f32 %v542_v46, 0.0  ;;  %1202 = vmatpush.bf16.msrb.mxu3 %v1713_v44 }
  0xed   : > { %v632_v51 = vpack.c.bf16 %v575_v48, %v573_v47 }
  0xee   : > { %v633_v52 = vpack.c.bf16 %v576_v50, %v574_v49 }
  0xef   : > { %819 = vmatmul.bf16.vlgmr.msra.gmra.mxu2 %v632_v51  ;;  %905 = vmatmul.bf16.vlgmr.msrb.gmra.mxu0 %v632_v51 }
  0xf0   : > { %862 = vmatmul.bf16.vlgmr.msra.gmra.mxu3 %v633_v52  ;;  %948 = vmatmul.bf16.vlgmr.msrb.gmra.mxu1 %v633_v52  ;;  %v501_v53 = vpop.f32.mrf.mxu0 }
  0xf1   : > { %v544_v54 = vpop.f32.mrf.mxu1  ;;  %v502_v57 = vadd.f32 %v501_v53, %v2247_v39 }
  0xf2   : > { %v545_v58 = vadd.f32 %v544_v54, %v2249_v40 }
  0xf3   : > { %v577_v63 = vmax.f32 %v502_v57, 0.0 }
  0xf4   : > { %v578_v1 = vmax.f32 %v545_v58, 0.0  ;;  %v1704_v58 = vld [vmem:[#allocation10 + $0x10] sm:$0xff] }
  0xf5   : > { %1160 = vmatpush.bf16.msrb.mxu2 %v1704_v58 }
  0xf8   : > { %v503_v59 = vpop.f32.mrf.mxu0 }
  0xf9   : > { %v504_v60 = vadd.f32 %v503_v59, %v2247_v39  ;;  %v546_v61 = vpop.f32.mrf.mxu1  ;;  %v1712_v59 = vld [vmem:[#allocation10 + $0x50] sm:$0xff] }
  0xfa   : > { %v547_v62 = vadd.f32 %v546_v61, %v2249_v40  ;;  %1203 = vmatpush.bf16.msrb.mxu3 %v1712_v59  ;;  %v1703_v61 = vld [vmem:[#allocation10 + $0x8] sm:$0xff] }
  0xfb   : > { %v579_v0 = vmax.f32 %v504_v60, 0.0  ;;  %1161 = vmatpush.bf16.msrb.mxu2 %v1703_v61 }
  0xfc   : > { %v580_v2 = vmax.f32 %v547_v62, 0.0  ;;  %v1711_v62 = vld [vmem:[#allocation10 + $0x48] sm:$0xff] }
  0xfd   : > { %v634_v3 = vpack.c.bf16 %v579_v0, %v577_v63 }
  0xfe   : > { %v635_v4 = vpack.c.bf16 %v580_v2, %v578_v1  ;;  %1204 = vmatpush.bf16.msrb.mxu3 %v1711_v62 }
  0xff   : > { %824 = vmatmul.bf16.gmra.mxu2 %v634_v3  ;;  %910 = vmatmul.bf16.gmra.mxu0 %v634_v3 }
 0x100   : > { %867 = vmatmul.bf16.gmra.mxu3 %v635_v4  ;;  %953 = vmatmul.bf16.gmra.mxu1 %v635_v4  ;;  %v506_v5 = vpop.f32.mrf.mxu0 }
 0x101   : > { %v549_v6 = vpop.f32.mrf.mxu1  ;;  %v507_v9 = vadd.f32 %v506_v5, %v2247_v39  ;;  %1162 = vmatpush.bf16.msrb.mxu2 %v1702_v22 }
 0x102   : > { %v550_v10 = vadd.f32 %v549_v6, %v2249_v40 }
 0x103   : > { %v581_v15 = vmax.f32 %v507_v9, 0.0 }
 0x104   : > { %v582_v17 = vmax.f32 %v550_v10, 0.0 }
 0x108   : > { %v508_v11 = vpop.f32.mrf.mxu0 }
 0x109   : > { %v509_v12 = vadd.f32 %v508_v11, %v2247_v39  ;;  %v551_v13 = vpop.f32.mrf.mxu1 }
 0x10a   : > { %v552_v14 = vadd.f32 %v551_v13, %v2249_v40 }
 0x10b   : > { %v583_v16 = vmax.f32 %v509_v12, 0.0 }
 0x10c   : > { %v584_v18 = vmax.f32 %v552_v14, 0.0 }
 0x10d   : > { %v636_v19 = vpack.c.bf16 %v583_v16, %v581_v15 }
 0x10e   : > { %v637_v20 = vpack.c.bf16 %v584_v18, %v582_v17 }
 0x10f   : > { %829 = vmatmul.bf16.gmra.mxu2 %v636_v19  ;;  %915 = vmatmul.bf16.gmra.mxu0 %v636_v19 }
 0x110   : > { %872 = vmatmul.bf16.gmra.mxu3 %v637_v20  ;;  %958 = vmatmul.bf16.gmra.mxu1 %v637_v20  ;;  %v511_v21 = vpop.f32.mrf.mxu0 }
 0x111   : > { %v554_v24 = vpop.f32.mrf.mxu1  ;;  %v512_v25 = vadd.f32 %v511_v21, %v2247_v39  ;;  %v1710_v21 = vld [vmem:[#allocation10 + $0x40] sm:$0xff] }
 0x112   : > { %v555_v26 = vadd.f32 %v554_v24, %v2249_v40  ;;  %1205 = vmatpush.bf16.msrb.mxu3 %v1710_v21 }
 0x113   : > { %v585_v31 = vmax.f32 %v512_v25, 0.0 }
 0x114   : > { %v586_v33 = vmax.f32 %v555_v26, 0.0 }
 0x118   : > { %v513_v27 = vpop.f32.mrf.mxu0 }
 0x119   : > { %v514_v28 = vadd.f32 %v513_v27, %v2247_v39  ;;  %v556_v29 = vpop.f32.mrf.mxu1 }
 0x11a   : > { %v557_v30 = vadd.f32 %v556_v29, %v2249_v40 }
 0x11b   : > { %v587_v32 = vmax.f32 %v514_v28, 0.0 }
 0x11c   : > { %v588_v34 = vmax.f32 %v557_v30, 0.0 }
 0x11d   : > { %v638_v37 = vpack.c.bf16 %v587_v32, %v585_v31 }
 0x11e   : > { %v639_v38 = vpack.c.bf16 %v588_v34, %v586_v33 }
 0x11f   : > { %834 = vmatmul.bf16.gmra.mxu2 %v638_v37  ;;  %920 = vmatmul.bf16.gmra.mxu0 %v638_v37 }
 0x120   : > { %877 = vmatmul.bf16.gmra.mxu3 %v639_v38  ;;  %963 = vmatmul.bf16.gmra.mxu1 %v639_v38  ;;  %v516_v41 = vpop.f32.mrf.mxu0 }
 0x121   : > { %v559_v42 = vpop.f32.mrf.mxu1  ;;  %v517_v45 = vadd.f32 %v516_v41, %v2247_v39 }
 0x122   : > { %v560_v46 = vadd.f32 %v559_v42, %v2249_v40 }
 0x123   : > { %v589_v51 = vmax.f32 %v517_v45, 0.0 }
 0x124   : > { %v590_v53 = vmax.f32 %v560_v46, 0.0 }
 0x128   : > { %v518_v47 = vpop.f32.mrf.mxu0 }
 0x129   : > { %v519_v48 = vadd.f32 %v518_v47, %v2247_v39  ;;  %v561_v49 = vpop.f32.mrf.mxu1 }
 0x12a   : > { %v562_v50 = vadd.f32 %v561_v49, %v2249_v40 }
 0x12b   : > { %v591_v52 = vmax.f32 %v519_v48, 0.0 }
 0x12c   : > { %v592_v54 = vmax.f32 %v562_v50, 0.0 }
 0x12d   : > { %v640_v55 = vpack.c.bf16 %v591_v52, %v589_v51 }
 0x12e   : > { %v641_v56 = vpack.c.bf16 %v592_v54, %v590_v53 }
 0x12f   : > { %839 = vmatmul.bf16.gmra.mxu2 %v640_v55  ;;  %925 = vmatmul.bf16.gmra.mxu0 %v640_v55 }
 0x130   : > { %882 = vmatmul.bf16.gmra.mxu3 %v641_v56  ;;  %968 = vmatmul.bf16.gmra.mxu1 %v641_v56  ;;  %v521_v57 = vpop.f32.mrf.mxu0 }
 0x131   : > { %v564_v60 = vpop.f32.mrf.mxu1  ;;  %v522_v63 = vadd.f32 %v521_v57, %v2247_v39 }
 0x132   : > { %v565_v0 = vadd.f32 %v564_v60, %v2249_v40 }
 0x133   : > { %v593_v5 = vmax.f32 %v522_v63, 0.0 }
 0x134   : > { %v594_v7 = vmax.f32 %v565_v0, 0.0 }
 0x138   : > { %v523_v1 = vpop.f32.mrf.mxu0 }
 0x139   : > { %v524_v2 = vadd.f32 %v523_v1, %v2247_v39  ;;  %v566_v3 = vpop.f32.mrf.mxu1 }
 0x13a   : > { %v567_v4 = vadd.f32 %v566_v3, %v2249_v40 }
 0x13b   : > { %v595_v6 = vmax.f32 %v524_v2, 0.0 }
 0x13c   : > { %v596_v8 = vmax.f32 %v567_v4, 0.0 }
 0x13d   : > { %v642_v9 = vpack.c.bf16 %v595_v6, %v593_v5 }
 0x13e   : > { %v643_v10 = vpack.c.bf16 %v596_v8, %v594_v7 }
 0x13f   : > { %844 = vmatmul.bf16.gmra.mxu2 %v642_v9  ;;  %930 = vmatmul.bf16.gmra.mxu0 %v642_v9 }
 0x140   : > { %887 = vmatmul.bf16.gmra.mxu3 %v643_v10  ;;  %973 = vmatmul.bf16.gmra.mxu1 %v643_v10  ;;  %v526_v11 = vpop.f32.mrf.mxu0 }
 0x141   : > { %v569_v12 = vpop.f32.mrf.mxu1  ;;  %v527_v13 = vadd.f32 %v526_v11, %v2247_v39  ;;  %v631_v39 = vld [vmem:[%s2383_s4] sm:$0x3] }
 0x142   : > { %v570_v14 = vadd.f32 %v569_v12, %v2249_v40  ;;  %v2280_v40 = vperm.slane %v631_v39, 1  ;;  %v2283_v27 = vperm.slane %v631_v39, 0 }
 0x143   : > { %v597_v15 = vmax.f32 %v527_v13, 0.0 }
 0x144   : > { %v598_v16 = vmax.f32 %v570_v14, 0.0 }
 0x145   : > { %v644_v19 = vpack.c.bf16 %v597_v15, %v597_v15 }
 0x146   : > { %v645_v20 = vpack.c.bf16 %v598_v16, %v598_v16 }
 0x148   : > { %v528_v17 = vpop.f32.mrf.mxu0 }
 0x149   : > { %v571_v18 = vpop.f32.mrf.mxu1 }
 0x14f   : > { %849 = vmatmul.bf16.gmra.mxu2 %v644_v19  ;;  %935 = vmatmul.bf16.gmra.mxu0 %v644_v19 }
 0x150   : > { %892 = vmatmul.bf16.gmra.mxu3 %v645_v20  ;;  %978 = vmatmul.bf16.gmra.mxu1 %v645_v20 }
 0x16c   : > { %v906_v23 = vpop.f32.mrf.mxu0 }
 0x16d   : > { %v949_v24 = vpop.f32.mrf.mxu1  ;;  %v907_v25 = vadd.f32 %v906_v23, %v2280_v40 }
 0x16f   : > { %v950_v30 = vadd.f32 %v949_v24, %v907_v25 }
 0x171   : > { %v984_v35 = vmax.f32 %v950_v30, 0.0 }
 0x172   : > { %v820_v26 = vpop.f32.mrf.mxu2 }
 0x173   : > { %v863_v28 = vpop.f32.mrf.mxu3  ;;  %v821_v33 = vadd.f32 %v820_v26, %v2283_v27 }
 0x174   : > { %v908_v29 = vpop.f32.mrf.mxu0 }
 0x175   : > { %v909_v31 = vadd.f32 %v908_v29, %v2280_v40  ;;  %v951_v32 = vpop.f32.mrf.mxu1  ;;  %v864_v38 = vadd.f32 %v863_v28, %v821_v33 }
 0x177   : > { %v952_v34 = vadd.f32 %v951_v32, %v909_v31  ;;  %v983_v47 = vmax.f32 %v864_v38, 0.0 }
 0x179   : > { %v986_v36 = vmax.f32 %v952_v34, 0.0 }
 0x17a   : > { %v822_v37 = vpop.f32.mrf.mxu2 }
 0x17b   : > { %v1043_v41 = vpack.c.bf16 %v986_v36, %v984_v35  ;;  %v823_v42 = vadd.f32 %v822_v37, %v2283_v27  ;;  %v865_v43 = vpop.f32.mrf.mxu3 }
 0x17c   : > { %v911_v44 = vpop.f32.mrf.mxu0 }
 0x17d   : > { %v866_v45 = vadd.f32 %v865_v43, %v823_v42  ;;  %v954_v46 = vpop.f32.mrf.mxu1  ;;  %1206 = vmatmul.bf16.vlgmr.msrb.gmra.mxu3 %v1043_v41  ;;  %v912_v49 = vadd.f32 %v911_v44, %v2280_v40 }
 0x17f   : > { %v985_v48 = vmax.f32 %v866_v45, 0.0  ;;  %v955_v54 = vadd.f32 %v954_v46, %v912_v49 }
 0x181   : > { %v1042_v50 = vpack.c.bf16 %v985_v48, %v983_v47  ;;  %v988_v59 = vmax.f32 %v955_v54, 0.0 }
 0x182   : > { %v825_v51 = vpop.f32.mrf.mxu2 }
 0x183   : > { %v868_v52 = vpop.f32.mrf.mxu3  ;;  %1163 = vmatmul.bf16.vlgmr.msrb.gmra.mxu2 %v1042_v50  ;;  %v826_v57 = vadd.f32 %v825_v51, %v2283_v27 }
 0x184   : > { %v913_v53 = vpop.f32.mrf.mxu0 }
 0x185   : > { %v914_v55 = vadd.f32 %v913_v53, %v2280_v40  ;;  %v956_v56 = vpop.f32.mrf.mxu1  ;;  %v869_v62 = vadd.f32 %v868_v52, %v826_v57 }
 0x187   : > { %v957_v58 = vadd.f32 %v956_v56, %v914_v55  ;;  %v987_v5 = vmax.f32 %v869_v62, 0.0 }
 0x189   : > { %v990_v60 = vmax.f32 %v957_v58, 0.0 }
 0x18a   : > { %v827_v61 = vpop.f32.mrf.mxu2 }
 0x18b   : > { %v828_v63 = vadd.f32 %v827_v61, %v2283_v27  ;;  %v870_v0 = vpop.f32.mrf.mxu3  ;;  %v1045_v1 = vpack.c.bf16 %v990_v60, %v988_v59 }
 0x18c   : > { %v916_v2 = vpop.f32.mrf.mxu0 }
 0x18d   : > { %v871_v3 = vadd.f32 %v870_v0, %v828_v63  ;;  %v959_v4 = vpop.f32.mrf.mxu1  ;;  %1211 = vmatmul.bf16.gmra.mxu3 %v1045_v1  ;;  %v917_v7 = vadd.f32 %v916_v2, %v2280_v40 }
 0x18f   : > { %v989_v6 = vmax.f32 %v871_v3, 0.0  ;;  %v960_v12 = vadd.f32 %v959_v4, %v917_v7 }
 0x191   : > { %v1044_v8 = vpack.c.bf16 %v989_v6, %v987_v5  ;;  %v992_v17 = vmax.f32 %v960_v12, 0.0 }
 0x192   : > { %v830_v9 = vpop.f32.mrf.mxu2 }
 0x193   : > { %v873_v10 = vpop.f32.mrf.mxu3  ;;  %1168 = vmatmul.bf16.gmra.mxu2 %v1044_v8  ;;  %v831_v15 = vadd.f32 %v830_v9, %v2283_v27 }
 0x194   : > { %v918_v11 = vpop.f32.mrf.mxu0 }
 0x195   : > { %v919_v13 = vadd.f32 %v918_v11, %v2280_v40  ;;  %v961_v14 = vpop.f32.mrf.mxu1  ;;  %v874_v20 = vadd.f32 %v873_v10, %v831_v15 }
 0x197   : > { %v962_v16 = vadd.f32 %v961_v14, %v919_v13  ;;  %v991_v26 = vmax.f32 %v874_v20, 0.0 }
 0x199   : > { %v994_v18 = vmax.f32 %v962_v16, 0.0 }
 0x19a   : > { %v832_v19 = vpop.f32.mrf.mxu2 }
 0x19b   : > { %v833_v21 = vadd.f32 %v832_v19, %v2283_v27  ;;  %v875_v22 = vpop.f32.mrf.mxu3  ;;  %v1047_v39 = vpack.c.bf16 %v994_v18, %v992_v17 }
 0x19c   : > { %v921_v23 = vpop.f32.mrf.mxu0 }
 0x19d   : > { %v876_v24 = vadd.f32 %v875_v22, %v833_v21  ;;  %v964_v25 = vpop.f32.mrf.mxu1  ;;  %1216 = vmatmul.bf16.gmra.mxu3 %v1047_v39  ;;  %v922_v29 = vadd.f32 %v921_v23, %v2280_v40 }
 0x19f   : > { %v993_v28 = vmax.f32 %v876_v24, 0.0  ;;  %v965_v34 = vadd.f32 %v964_v25, %v922_v29 }
 0x1a1   : > { %v1046_v30 = vpack.c.bf16 %v993_v28, %v991_v26  ;;  %v996_v41 = vmax.f32 %v965_v34, 0.0 }
 0x1a2   : > { %v835_v31 = vpop.f32.mrf.mxu2 }
 0x1a3   : > { %v878_v32 = vpop.f32.mrf.mxu3  ;;  %1173 = vmatmul.bf16.gmra.mxu2 %v1046_v30  ;;  %v836_v37 = vadd.f32 %v835_v31, %v2283_v27 }
 0x1a4   : > { %v923_v33 = vpop.f32.mrf.mxu0 }
 0x1a5   : > { %v924_v35 = vadd.f32 %v923_v33, %v2280_v40  ;;  %v966_v36 = vpop.f32.mrf.mxu1  ;;  %v879_v44 = vadd.f32 %v878_v32, %v836_v37 }
 0x1a7   : > { %v967_v38 = vadd.f32 %v966_v36, %v924_v35  ;;  %v995_v51 = vmax.f32 %v879_v44, 0.0 }
 0x1a9   : > { %v998_v42 = vmax.f32 %v967_v38, 0.0 }
 0x1aa   : > { %v837_v43 = vpop.f32.mrf.mxu2 }
 0x1ab   : > { %v838_v45 = vadd.f32 %v837_v43, %v2283_v27  ;;  %v880_v46 = vpop.f32.mrf.mxu3  ;;  %v1049_v47 = vpack.c.bf16 %v998_v42, %v996_v41 }
 0x1ac   : > { %v926_v48 = vpop.f32.mrf.mxu0 }
 0x1ad   : > { %v881_v49 = vadd.f32 %v880_v46, %v838_v45  ;;  %v969_v50 = vpop.f32.mrf.mxu1  ;;  %1221 = vmatmul.bf16.gmra.mxu3 %v1049_v47  ;;  %v927_v53 = vadd.f32 %v926_v48, %v2280_v40 }
 0x1af   : > { %v997_v52 = vmax.f32 %v881_v49, 0.0  ;;  %v970_v58 = vadd.f32 %v969_v50, %v927_v53  ;;  %v2313_v50 = vld [vmem:[%s2385_s6] ss:$0 sm:$0xff] }
 0x1b1   : > { %v1048_v54 = vpack.c.bf16 %v997_v52, %v995_v51  ;;  %v1000_v63 = vmax.f32 %v970_v58, 0.0 }
 0x1b2   : > { %v840_v55 = vpop.f32.mrf.mxu2 }
 0x1b3   : > { %v883_v56 = vpop.f32.mrf.mxu3  ;;  %1178 = vmatmul.bf16.gmra.mxu2 %v1048_v54  ;;  %v841_v61 = vadd.f32 %v840_v55, %v2283_v27 }
 0x1b4   : > { %v928_v57 = vpop.f32.mrf.mxu0 }
 0x1b5   : > { %v929_v59 = vadd.f32 %v928_v57, %v2280_v40  ;;  %v971_v60 = vpop.f32.mrf.mxu1  ;;  %v884_v2 = vadd.f32 %v883_v56, %v841_v61 }
 0x1b7   : > { %v972_v62 = vadd.f32 %v971_v60, %v929_v59  ;;  %v999_v9 = vmax.f32 %v884_v2, 0.0 }
 0x1b9   : > { %v1002_v0 = vmax.f32 %v972_v62, 0.0 }
 0x1ba   : > { %v842_v1 = vpop.f32.mrf.mxu2 }
 0x1bb   : > { %v843_v3 = vadd.f32 %v842_v1, %v2283_v27  ;;  %v885_v4 = vpop.f32.mrf.mxu3  ;;  %v1051_v5 = vpack.c.bf16 %v1002_v0, %v1000_v63 }
 0x1bc   : > { %v931_v6 = vpop.f32.mrf.mxu0 }
 0x1bd   : > { %v886_v7 = vadd.f32 %v885_v4, %v843_v3  ;;  %v974_v8 = vpop.f32.mrf.mxu1  ;;  %1226 = vmatmul.bf16.gmra.mxu3 %v1051_v5  ;;  %v932_v11 = vadd.f32 %v931_v6, %v2280_v40 }
 0x1bf   : > { %v1001_v10 = vmax.f32 %v886_v7, 0.0  ;;  %v975_v16 = vadd.f32 %v974_v8, %v932_v11 }
 0x1c1   : > { %v1050_v12 = vpack.c.bf16 %v1001_v10, %v999_v9  ;;  %v1004_v21 = vmax.f32 %v975_v16, 0.0 }
 0x1c2   : > { %v845_v13 = vpop.f32.mrf.mxu2 }
 0x1c3   : > { %v888_v14 = vpop.f32.mrf.mxu3  ;;  %1183 = vmatmul.bf16.gmra.mxu2 %v1050_v12  ;;  %v846_v19 = vadd.f32 %v845_v13, %v2283_v27 }
 0x1c4   : > { %v933_v15 = vpop.f32.mrf.mxu0 }
 0x1c5   : > { %v934_v17 = vadd.f32 %v933_v15, %v2280_v40  ;;  %v976_v18 = vpop.f32.mrf.mxu1  ;;  %v889_v23 = vadd.f32 %v888_v14, %v846_v19 }
 0x1c7   : > { %v977_v20 = vadd.f32 %v976_v18, %v934_v17  ;;  %v1003_v32 = vmax.f32 %v889_v23, 0.0 }
 0x1c9   : > { %v1006_v22 = vmax.f32 %v977_v20, 0.0 }
 0x1ca   : > { %v847_v39 = vpop.f32.mrf.mxu2 }
 0x1cb   : > { %v1053_v24 = vpack.c.bf16 %v1006_v22, %v1004_v21  ;;  %v848_v25 = vadd.f32 %v847_v39, %v2283_v27  ;;  %v890_v26 = vpop.f32.mrf.mxu3 }
 0x1cc   : > { %v936_v28 = vpop.f32.mrf.mxu0 }
 0x1cd   : > { %v891_v29 = vadd.f32 %v890_v26, %v848_v25  ;;  %v937_v30 = vadd.f32 %v936_v28, %v2280_v40  ;;  %1231 = vmatmul.bf16.gmra.mxu3 %v1053_v24  ;;  %v979_v31 = vpop.f32.mrf.mxu1 }
 0x1cf   : > { %v1005_v33 = vmax.f32 %v891_v29, 0.0  ;;  %v980_v35 = vadd.f32 %v979_v31, %v937_v30 }
 0x1d1   : > { %v1052_v34 = vpack.c.bf16 %v1005_v33, %v1003_v32  ;;  %v1008_v42 = vmax.f32 %v980_v35, 0.0 }
 0x1d2   : > { %v850_v36 = vpop.f32.mrf.mxu2 }
 0x1d3   : > { %v851_v37 = vadd.f32 %v850_v36, %v2283_v27  ;;  %1188 = vmatmul.bf16.gmra.mxu2 %v1052_v34  ;;  %v893_v38 = vpop.f32.mrf.mxu3  ;;  %v1055_v45 = vpack.c.bf16 %v1008_v42, %v1008_v42 }
 0x1d4   : > { %v938_v41 = vpop.f32.mrf.mxu0 }
 0x1d5   : > { %v981_v43 = vpop.f32.mrf.mxu1  ;;  %v894_v44 = vadd.f32 %v893_v38, %v851_v37 }
 0x1d7   : > { %v1007_v47 = vmax.f32 %v894_v44, 0.0 }
 0x1d9   : > { %v1054_v48 = vpack.c.bf16 %v1007_v47, %v1007_v47 }
 0x1da   : > { %v852_v46 = vpop.f32.mrf.mxu2 }
 0x1db   : > { %v895_v40 = vpop.f32.mrf.mxu3 }
 0x1dd   : > { %1236 = vmatmul.bf16.gmra.mxu3 %v1055_v45 }
 0x1e3   : > { %1193 = vmatmul.bf16.gmra.mxu2 %v1054_v48 }
 0x200   : > { %v1207_v49 = vpop.f32.mrf.mxu3 }
 0x206   : > { %v1164_v27 = vpop.f32.mrf.mxu2 }
 0x207   : > { %v1165_v51 = vadd.f32 %v2313_v50, %v1164_v27 }
 0x208   : > { %v1209_v52 = vpop.f32.mrf.mxu3 }
 0x209   : > { %v1208_v53 = vadd.f32 %v1207_v49, %v1165_v51 }
 0x20b   : > { %1241 = vst [vmem:[%s2318_s21] sm:$0xff] %v1208_v53 }
 0x20e   : > { %v1166_v54 = vpop.f32.mrf.mxu2 }
 0x20f   : > { %v1167_v55 = vadd.f32 %v2313_v50, %v1166_v54 }
 0x210   : > { %v1212_v56 = vpop.f32.mrf.mxu3 }
 0x211   : > { %v1210_v57 = vadd.f32 %v1209_v52, %v1167_v55 }
 0x213   : > { %1242 = vst [vmem:[%s2318_s21 + $0x8] sm:$0xff] %v1210_v57 }
 0x216   : > { %v1169_v58 = vpop.f32.mrf.mxu2 }
 0x217   : > { %v1170_v59 = vadd.f32 %v2313_v50, %v1169_v58 }
 0x218   : > { %v1214_v60 = vpop.f32.mrf.mxu3 }
 0x219   : > { %v1213_v61 = vadd.f32 %v1212_v56, %v1170_v59 }
 0x21b   : > { %1243 = vst [vmem:[%s2318_s21 + $0x10] sm:$0xff] %v1213_v61 }
 0x21e   : > { %v1171_v62 = vpop.f32.mrf.mxu2 }
 0x21f   : > { %v1172_v63 = vadd.f32 %v2313_v50, %v1171_v62 }
 0x220   : > { %v1217_v0 = vpop.f32.mrf.mxu3 }
 0x221   : > { %v1215_v1 = vadd.f32 %v1214_v60, %v1172_v63 }
 0x223   : > { %1244 = vst [vmem:[%s2318_s21 + $0x18] sm:$0xff] %v1215_v1 }
 0x226   : > { %v1174_v2 = vpop.f32.mrf.mxu2 }
 0x227   : > { %v1175_v3 = vadd.f32 %v2313_v50, %v1174_v2 }
 0x228   : > { %v1219_v4 = vpop.f32.mrf.mxu3 }
 0x229   : > { %v1218_v5 = vadd.f32 %v1217_v0, %v1175_v3 }
 0x22b   : > { %1245 = vst [vmem:[%s2318_s21 + $0x20] sm:$0xff] %v1218_v5 }
 0x22e   : > { %v1176_v6 = vpop.f32.mrf.mxu2 }
 0x22f   : > { %v1177_v7 = vadd.f32 %v2313_v50, %v1176_v6 }
 0x230   : > { %v1222_v8 = vpop.f32.mrf.mxu3 }
 0x231   : > { %v1220_v9 = vadd.f32 %v1219_v4, %v1177_v7 }
 0x233   : > { %1246 = vst [vmem:[%s2318_s21 + $0x28] sm:$0xff] %v1220_v9 }
 0x236   : > { %v1179_v10 = vpop.f32.mrf.mxu2 }
 0x237   : > { %v1180_v11 = vadd.f32 %v2313_v50, %v1179_v10 }
 0x238   : > { %v1224_v12 = vpop.f32.mrf.mxu3 }
 0x239   : > { %v1223_v13 = vadd.f32 %v1222_v8, %v1180_v11 }
 0x23b   : > { %1247 = vst [vmem:[%s2318_s21 + $0x30] sm:$0xff] %v1223_v13 }
 0x23e   : > { %v1181_v14 = vpop.f32.mrf.mxu2 }
 0x23f   : > { %v1182_v15 = vadd.f32 %v2313_v50, %v1181_v14 }
 0x240   : > { %v1227_v16 = vpop.f32.mrf.mxu3 }
 0x241   : > { %v1225_v17 = vadd.f32 %v1224_v12, %v1182_v15 }
 0x243   : > { %1248 = vst [vmem:[%s2318_s21 + $0x38] sm:$0xff] %v1225_v17 }
 0x246   : > { %v1184_v18 = vpop.f32.mrf.mxu2 }
 0x247   : > { %v1185_v19 = vadd.f32 %v2313_v50, %v1184_v18 }
 0x248   : > { %v1229_v20 = vpop.f32.mrf.mxu3 }
 0x249   : > { %v1228_v21 = vadd.f32 %v1227_v16, %v1185_v19 }
 0x24b   : > { %1249 = vst [vmem:[%s2318_s21 + $0x40] sm:$0xff] %v1228_v21 }
 0x24e   : > { %v1186_v22 = vpop.f32.mrf.mxu2 }
 0x24f   : > { %v1187_v39 = vadd.f32 %v2313_v50, %v1186_v22 }
 0x250   : > { %v1232_v23 = vpop.f32.mrf.mxu3 }
 0x251   : > { %v1230_v24 = vadd.f32 %v1229_v20, %v1187_v39 }
 0x253   : > { %1250 = vst [vmem:[%s2318_s21 + $0x48] sm:$0xff] %v1230_v24 }
 0x256   : > { %v1189_v25 = vpop.f32.mrf.mxu2 }
 0x257   : > { %v1190_v26 = vadd.f32 %v2313_v50, %v1189_v25 }
 0x258   : > { %v1234_v28 = vpop.f32.mrf.mxu3 }
 0x259   : > { %v1233_v29 = vadd.f32 %v1232_v23, %v1190_v26 }
 0x25b   : > { %1251 = vst [vmem:[%s2318_s21 + $0x50] sm:$0xff] %v1233_v29 }
 0x25e   : > { %v1191_v30 = vpop.f32.mrf.mxu2 }
 0x25f   : > { %v1192_v31 = vadd.f32 %v2313_v50, %v1191_v30 }
 0x260   : > { %v1237_v32 = vpop.f32.mrf.mxu3 }
 0x261   : > { %v1235_v33 = vadd.f32 %v1234_v28, %v1192_v31 }
 0x263   : > { %1252 = vst [vmem:[%s2318_s21 + $0x58] sm:$0xff] %v1235_v33 }
 0x266   : > { %v1194_v34 = vpop.f32.mrf.mxu2 }
 0x267   : > { %v1195_v35 = vadd.f32 %v2313_v50, %v1194_v34 }
 0x268   : > { %v1239_v36 = vpop.f32.mrf.mxu3 }
 0x269   : > { %v1238_v37 = vadd.f32 %v1237_v32, %v1195_v35 }
 0x26b   : > { %1253 = vst [vmem:[%s2318_s21 + $0x60] sm:$0xff] %v1238_v37 }
 0x26c   : > { %1992 = shalt.err (!%p1989_p10)
}
 0x26d   : > { %s2049_s2 = smov 128   ;;  %s2050_s19 = smov 8  }
 0x26e   : > { %1739 = dma.vmem_to_hbm [thread:$0]  (%p2184_p5), %s1268_s18, 1664, %s1270_s11, %s1255_s28, %s2049_s2, %s2049_s2, %s2050_s19   ;;  %v1196_v38 = vpop.f32.mrf.mxu2 }
 0x26f PF: > { %s1284_s16 = sand.u32 1, %s2027_s24   ;;  %p2403_p12 = scmp.ge.s32.totalorder %s2039_s27, 2 }
 0x270   : > { %s1285_s21 = scalar_lea.sflag [#allocation4], %s1284_s16 }
 0x271   : > { %p1759_p13 = pnand %p2403_p12, %p2126_p6 }
 0x273   : > { %p1760_p0 = pneg %p1759_p13 }
 0x275   : > { %2022 = dma.done.wait (%p1760_p0), %s1285_s21, 1664  }
 0x276   : > { %2024 = vsyncadd (%p1760_p0), %s1285_s21, 4294965632  ;;  %p22_p3 = scmp.ge.s32.totalorder %s2171_s23, 4   ;;  %s2404_s24 = smov %s2031_s25 }
 0x277   : > { %s2405_s25 = smov %s2035_s26  ;;  %s2406_s26 = smov %s2180_s13 }
 0x278   : > { %s2407_s27 = smov %s2171_s23  ;;  %24 = sbr.rel (!%p22_p3) target bundleno = 11 (0xb), region = 109 }
 0x27d   :  { %1291 = vsyncpa [#allocation3], 1 }
 0x27e   :  { %1293 = vsyncpa [#allocation3 + $0x1], 1 }
 0x27f   :  { %1294 = vsyncpa [#allocation6], 1 }
 0x280   :  { %1295 = vsyncpa [#allocation9], 1 }
 0x281   :  { %1296 = vsyncpa [#allocation4], 1 }
 0x282   :  { %1298 = vsyncpa [#allocation4 + $0x1], 1 }

</bundles_post_ra>
